<compile_context>
chip_gen: v7x
topology: tpu7x:2x2x1
jax: 0.10.0
libtpu: 0.0.40
codegen_flags: <defaults>
</compile_context>

<pallas_src>
import math

import jax
import jax.numpy as jnp
from jax.experimental import pallas as pl
from jax.experimental.pallas import tpu as pltpu


def _round_up(v, m):
    return ((v + m - 1) // m) * m


def _vmem_limit_bytes():
    """Per-generation VMEM budget (leave headroom for Mosaic scratch)."""
    cap = 64 * 1024 * 1024  # conservative default: v7x per-TC VMEM
    try:
        info = pltpu.get_tpu_info()
        cap = int(getattr(info, "vmem_capacity_bytes", cap))
    except Exception:
        pass
    # v7x (64 MiB) -> 48 MiB; v5e/v6e (128 MiB) -> 96 MiB (capped at 100 MiB).
    return min((cap // 4) * 3, 100 * 1024 * 1024)


# ----------------------------------------------------------------------------
# Kernels
# ----------------------------------------------------------------------------
def _fused_head_kernel(x_ref, w_ref, b_ref, t_ref, o_ref):
    """Resident-weight path: one batch tile per grid step, full weight in VMEM.

    x_ref: [tm, F_pad] f32 (cast to bf16 here, under the DMA)
    w_ref: [F_pad, K_pad] bf16 (constant index_map -> DMA'd once, resident)
    b_ref: [1, K_pad] f32, t_ref: [1] f32 SMEM, o_ref: [tm, K_pad] f32
    """
    inv_t = 1.0 / t_ref[0]
    x_bf = x_ref[...].astype(jnp.bfloat16)
    acc = jnp.dot(x_bf, w_ref[...], preferred_element_type=jnp.float32)
    o_ref[...] = ((acc + b_ref[...]) * inv_t).astype(o_ref.dtype)


def _tiled_head_kernel(x_ref, w_ref, b_ref, t_ref, o_ref, acc_ref):
    """Streaming fallback: (M, N, K) grid, reduction axis innermost.

    x_ref: [tm, tk] f32, w_ref: [tk, tn] bf16, b_ref: [1, tn] f32,
    t_ref: [1] f32 SMEM, o_ref: [tm, tn] f32, acc_ref: [tm, tn] f32 VMEM.
    """
    k = pl.program_id(2)

    @pl.when(k == 0)
    def _():
        acc_ref[...] = jnp.zeros_like(acc_ref)

    acc_ref[...] += jnp.dot(x_ref[...].astype(jnp.bfloat16), w_ref[...],
                            preferred_element_type=jnp.float32)

    @pl.when(k == pl.num_programs(2) - 1)
    def _():
        inv_t = 1.0 / t_ref[0]
        o_ref[...] = ((acc_ref[...] + b_ref[...]) * inv_t).astype(o_ref.dtype)


# ----------------------------------------------------------------------------
# Parameter preparation (done once; amortized across calls)
# ----------------------------------------------------------------------------
def prepare_head_params(weight, bias):
    """Pad head params to lane/sublane-friendly shapes once (stored layout).

    weight: [F, K] f32  ->  [F_pad, K_pad] bf16   (both mult. of 128)
    bias:   [K]    f32  ->  [1, K_pad]     f32
    """
    F, K = weight.shape
    F_pad = _round_up(F, 128)
    K_pad = _round_up(K, 128)
    w_pad = jnp.zeros((F_pad, K_pad), jnp.bfloat16).at[:F, :K].set(
        weight.astype(jnp.bfloat16))
    b_pad = jnp.zeros((1, K_pad), jnp.float32).at[0, :K].set(
        bias.astype(jnp.float32))
    return w_pad, b_pad, K


def _buffered_spec(block_shape, index_map, depth):
    """BlockSpec with deeper multi-buffering; plain spec if depth<=2 / unsupported."""
    if depth <= 2:
        return pl.BlockSpec(block_shape, index_map)
    try:
        return pl.BlockSpec(block_shape, index_map, pipeline_mode=pl.Buffered(depth))
    except TypeError:  # older BlockSpec signature
        return pl.BlockSpec(block_shape, index_map)


# ----------------------------------------------------------------------------
# Forward
# ----------------------------------------------------------------------------
def temp_scaling_forward(x_nchw, w_pad, b_pad, temperature, num_classes,
                         max_resident_weight_bytes=None):
    """Forward pass: synthetic linear head + temperature scaling.

    x_nchw:      [B, C, H, W]      float32
    w_pad:       [F_pad, K_pad]    bfloat16 (pre-padded, prepare_head_params)
    b_pad:       [1, K_pad]        float32
    temperature: [1]               float32
    returns:     [B, num_classes]  float32 (logits / T)
    """
    B = int(x_nchw.shape[0])
    F = math.prod(int(d) for d in x_nchw.shape[1:])
    F_pad, K_pad = (int(s) for s in w_pad.shape)

    vmem_limit = _vmem_limit_bytes()
    if max_resident_weight_bytes is None:
        # Leave room for double-buffered x/out blocks alongside the weight.
        max_resident_weight_bytes = vmem_limit // 3

    # ---- batch tile selection (16-sublane safe for f32 and bf16) ----------
    b16 = _round_up(B, 16)
    if b16 <= 128:
        tm = b16                     # single tiny tile
    elif b16 <= 256:
        tm = 128                     # >= 2 tiles -> both v7x TCs engage
    elif b16 <= 1024:
        tm = 256                     # fewer weight/x re-fetches, still >= 2 tiles
    else:
        tm = 512
    B_pad = _round_up(B, tm)

    # ---- x: keep f32, pad only if needed (bf16 cast happens in-kernel) ----
    x_flat = x_nchw.reshape(B, F).astype(jnp.float32)
    if (B_pad, F_pad) != (B, F):
        x_p = jnp.pad(x_flat, ((0, B_pad - B), (0, F_pad - F)))
    else:
        x_p = x_flat

    w_bytes = F_pad * K_pad * 2
    resident_vmem = (2 * w_bytes                 # weight block (double-buffered)
                     + 2 * tm * F_pad * 4        # x blocks (f32, double-buffered)
                     + 2 * tm * K_pad * 4        # out blocks
                     + 2 * K_pad * 4)            # bias
    use_resident = (w_bytes <= max_resident_weight_bytes
                    and resident_vmem <= vmem_limit)

    if use_resident:
        # ---- resident-weight fast path: grid over batch tiles only --------
        cost = pl.CostEstimate(
            flops=2 * B_pad * F_pad * K_pad,
            transcendentals=0,
            bytes_accessed=(4 * B_pad * F_pad      # x f32, streamed once
                            + 2 * F_pad * K_pad    # weight bf16, streamed once
                            + 4 * K_pad            # bias
                            + 4 * B_pad * K_pad    # output f32
                            + 4),                  # T
        )
        out_pad = pl.pallas_call(
            _fused_head_kernel,
            out_shape=jax.ShapeDtypeStruct((B_pad, K_pad), jnp.float32),
            grid_spec=pltpu.PrefetchScalarGridSpec(
                num_scalar_prefetch=0,
                grid=(B_pad // tm,),
                in_specs=[
                    pl.BlockSpec((tm, F_pad), lambda i: (i, 0)),       # x tile
                    pl.BlockSpec((F_pad, K_pad), lambda i: (0, 0)),    # W resident
                    pl.BlockSpec((1, K_pad), lambda i: (0, 0)),        # bias
                    pl.BlockSpec(memory_space=pltpu.MemorySpace.SMEM),  # T scalar
                ],
                out_specs=pl.BlockSpec((tm, K_pad), lambda i: (i, 0)),
            ),
            compiler_params=pltpu.CompilerParams(
                dimension_semantics=("parallel",),
                vmem_limit_bytes=vmem_limit,
            ),
            cost_estimate=cost,
        )(x_p, w_pad, b_pad, temperature)
    else:
        # ---- streaming fallback: tiled (M, N, K) with f32 accumulator -----
        tn = 256 if (K_pad % 256 == 0) else 128    # match 2x256^2 MXU when possible
        if F_pad % 512 == 0:
            tk = 512
        elif F_pad % 256 == 0:
            tk = 256
        else:
            tk = 128
        n_k = F_pad // tk
        depth = 3 if n_k >= 3 else 2               # deeper buffering on streamed specs
        grid = (B_pad // tm, K_pad // tn, n_k)

        cost = pl.CostEstimate(
            flops=2 * B_pad * F_pad * K_pad,
            transcendentals=0,
            bytes_accessed=(4 * B_pad * F_pad * (K_pad // tn)    # x re-streamed per j
                            + 2 * F_pad * K_pad * (B_pad // tm)  # W re-streamed per i
                            + 4 * K_pad
                            + 4 * B_pad * K_pad
                            + 4),
        )
        out_pad = pl.pallas_call(
            _tiled_head_kernel,
            out_shape=jax.ShapeDtypeStruct((B_pad, K_pad), jnp.float32),
            grid_spec=pltpu.PrefetchScalarGridSpec(
                num_scalar_prefetch=0,
                grid=grid,
                in_specs=[
                    _buffered_spec((tm, tk), lambda i, j, k: (i, k), depth),   # x
                    _buffered_spec((tk, tn), lambda i, j, k: (k, j), depth),   # W
                    pl.BlockSpec((1, tn), lambda i, j, k: (0, j)),             # bias
                    pl.BlockSpec(memory_space=pltpu.MemorySpace.SMEM),         # T
                ],
                out_specs=pl.BlockSpec((tm, tn), lambda i, j, k: (i, j)),
                scratch_shapes=[pltpu.VMEM((tm, tn), jnp.float32)],
            ),
            compiler_params=pltpu.CompilerParams(
                dimension_semantics=("parallel", "parallel", "arbitrary"),
                vmem_limit_bytes=vmem_limit,
            ),
            cost_estimate=cost,
        )(x_p, w_pad, b_pad, temperature)

    # Slice the padding back off in the wrapper.
    return out_pad[:B, :num_classes]


if __name__ == "__main__":
    # Small shapes consistent with an image-classifier forward: NCHW input.
    B, C, H, W = 2, 4, 16, 16
    K = 10                       # number of classes
    Feat = C * H * W             # 1024

    key = jax.random.PRNGKey(0)
    kx, kw, kb = jax.random.split(key, 3)
    x = jax.random.normal(kx, (B, C, H, W), dtype=jnp.float32)
    weight = jax.random.normal(kw, (Feat, K), dtype=jnp.float32) * 0.02
    bias = jax.random.normal(kb, (K,), dtype=jnp.float32) * 0.01
    # nn.Parameter(torch.ones(1) * 1.5)
    temperature = jnp.ones((1,), dtype=jnp.float32) * 1.5

    w_pad, b_pad, num_classes = prepare_head_params(weight, bias)

    # Reference: same bf16-rounded matmul operands (intentional precision
    # choice for the MXU), exact f32 accumulation, then bias and /T.
    x_bf = x.reshape(B, Feat).astype(jnp.bfloat16).astype(jnp.float32)
    w_bf = weight.astype(jnp.bfloat16).astype(jnp.float32)
    ref = (jnp.dot(x_bf, w_bf, precision=jax.lax.Precision.HIGHEST)
           + bias) / temperature[0]

    # Path 1: resident-weight fused kernel (common case).
    out = temp_scaling_forward(x, w_pad, b_pad, temperature, num_classes)
    out = jax.block_until_ready(out)
    assert out.shape == (B, K)
    assert jnp.allclose(out, ref, atol=1e-3, rtol=1e-3), (
        float(jnp.max(jnp.abs(out - ref))))

    # Path 2: streaming fallback (forced), used when the weight exceeds the
    # per-generation VMEM budget.
    out2 = temp_scaling_forward(x, w_pad, b_pad, temperature, num_classes,
                                max_resident_weight_bytes=0)
    out2 = jax.block_until_ready(out2)
    assert jnp.allclose(out2, ref, atol=1e-3, rtol=1e-3), (
        float(jnp.max(jnp.abs(out2 - ref))))

    print("KERNEL_OK")
</pallas_src>

<mosaic_0001>
module attributes {stable_mosaic.version = 11 : i64} {
  func.func @_fused_head_kernel(%arg0: i32, %arg1: memref<16x1024xf32, #tpu.memory_space<vmem>>, %arg2: memref<1024x128xbf16, #tpu.memory_space<vmem>>, %arg3: memref<1x128xf32, #tpu.memory_space<vmem>>, %arg4: memref<1xf32, #tpu.memory_space<smem>>, %arg5: memref<16x128xf32, #tpu.memory_space<vmem>>) attributes {dimension_semantics = [#tpu.dimension_semantics<parallel>], iteration_bounds = array<i64: 1>, scalar_prefetch = 0 : i64, scratch_operands = 0 : i64, tpu.core_type = #tpu.core_type<tc>, window_params = [{transform_indices = @transform_0, window_bounds = array<i64: 16, 1024>}, {pipeline_mode = #tpu.pipeline_mode<synchronous>, transform_indices = @transform_1, window_bounds = array<i64: 1024, 128>}, {pipeline_mode = #tpu.pipeline_mode<synchronous>, transform_indices = @transform_2, window_bounds = array<i64: 1, 128>}, {transform_indices = @transform_3, window_bounds = array<i64: 1>}, {transform_indices = @transform_4, window_bounds = array<i64: 16, 128>}]} {
    %c0 = arith.constant 0 : index
    %0 = memref.load %arg4[%c0] : memref<1xf32, #tpu.memory_space<smem>>
    %cst = arith.constant 1.000000e+00 : f32
    %1 = arith.divf %cst, %0 : f32
    %c0_0 = arith.constant 0 : index
    %c0_1 = arith.constant 0 : index
    %2 = vector.load %arg1[%c0_0, %c0_1] : memref<16x1024xf32, #tpu.memory_space<vmem>>, vector<16x1024xf32>
    %3 = arith.truncf %2 : vector<16x1024xf32> to vector<16x1024xbf16>
    %c0_2 = arith.constant 0 : index
    %c0_3 = arith.constant 0 : index
    %4 = vector.load %arg2[%c0_2, %c0_3] : memref<1024x128xbf16, #tpu.memory_space<vmem>>, vector<1024x128xbf16>
    %cst_4 = arith.constant dense<0.000000e+00> : vector<16x128xf32>
    %5 = tpu.matmul %3, %4, %cst_4 {dimension_numbers = #tpu.dot_dimension_numbers<[1], [0], [0], [1], [0, 0, 1, 1], [], []>} : vector<16x1024xbf16>, vector<1024x128xbf16>, vector<16x128xf32> -> vector<16x128xf32>
    %c0_5 = arith.constant 0 : index
    %c0_6 = arith.constant 0 : index
    %6 = vector.load %arg3[%c0_5, %c0_6] : memref<1x128xf32, #tpu.memory_space<vmem>>, vector<1x128xf32>
    %7 = vector.broadcast %6 : vector<1x128xf32> to vector<16x128xf32>
    %8 = arith.addf %5, %7 : vector<16x128xf32>
    %9 = vector.broadcast %1 : f32 to vector<16x128xf32>
    %10 = arith.mulf %8, %9 : vector<16x128xf32>
    %c0_7 = arith.constant 0 : index
    %c0_8 = arith.constant 0 : index
    %11 = vector.load %arg5[%c0_7, %c0_8] : memref<16x128xf32, #tpu.memory_space<vmem>>, vector<16x128xf32>
    tpu.vector_store %arg5[%c0_7, %c0_8], %10 {strides = array<i32>} : memref<16x128xf32, #tpu.memory_space<vmem>>, vector<16x128xf32>,
    return
  }
  func.func @transform_0(%arg0: i32) -> (i32, i32) {
    %c0_i32 = arith.constant 0 : i32
    %c0_i32_0 = arith.constant 0 : i32
    return %arg0, %c0_i32 : i32, i32
  }
  func.func @transform_1(%arg0: i32) -> (i32, i32) {
    %c0_i32 = arith.constant 0 : i32
    %c0_i32_0 = arith.constant 0 : i32
    %c0_i32_1 = arith.constant 0 : i32
    return %c0_i32, %c0_i32_0 : i32, i32
  }
  func.func @transform_2(%arg0: i32) -> (i32, i32) {
    %c0_i32 = arith.constant 0 : i32
    %c0_i32_0 = arith.constant 0 : i32
    %c0_i32_1 = arith.constant 0 : i32
    return %c0_i32, %c0_i32_0 : i32, i32
  }
  func.func @transform_3(%arg0: i32) -> i32 {
    %c0_i32 = arith.constant 0 : i32
    %c0_i32_0 = arith.constant 0 : i32
    return %c0_i32 : i32
  }
  func.func @transform_4(%arg0: i32) -> (i32, i32) {
    %c0_i32 = arith.constant 0 : i32
    %c0_i32_0 = arith.constant 0 : i32
    return %arg0, %c0_i32 : i32, i32
  }
}

</mosaic_0001>

<bundles_post_ra>
// kernel: tpu_custom_call.1
= control target key start
LH: loop header
LB: loop body
LE: loop exit
PB: predicated region body
PF: predicated region fallthrough
CT: control target
= control target key end

     0   :  { %10 = vsyncpa [#allocation4], 0  ;;  %s1158_s0 = inlined_call_operand.hbm [shape: f32[16,1024], index: 0, kind: input, shape index: {}]   ;;  %s1159_s1 = inlined_call_operand.hbm [shape: bf16[1024,128], index: 1, kind: input, shape index: {}]   ;;  %s1160_s2 = inlined_call_operand.vmem [shape: f32[1,128], index: 2, kind: input, shape index: {}]   ;;  %s1161_s3 = inlined_call_operand.<no memory space> [shape: f32[1], index: 3, kind: input, shape index: {}]   ;;  %s1162_s4 = inlined_call_operand.hbm [shape: f32[16,128], index: 4, kind: output, shape index: {}]  }
   0x1   :  { %11 = vsyncpa [#allocation7], 0 }
   0x2   :  { %12 = vsyncpa [#allocation5], 0  ;;  %s1083_s15 = smov [#allocation3]   ;;  %s1011_s19 = scalar_lea.hbm %s1158_s0, 2048 }
   0x3   :  { %s18_s16 = sshll.u32 %s1083_s15, 4  ;;  %p1012_p0 = scmp.ne.s32.totalorder %s1158_s0, %s1011_s19  ;;  %s19_s16 = int_to_ptr.vmem [resolvable:$true] %s18_s16 }
   0x4   :  { %p1015_p1 = scmp.lt.u32.totalorder %s1011_s19, %s1158_s0 }
   0x6   :  { %p1017_p2 = pnand %p1015_p1, %p1012_p0 }
   0x8   :  { %1020 = shalt.err (!%p1017_p2)
}
   0x9   :  { %s1021_s24 = scalar_lea.vmem %s19_s16, 2048  ;;  %p1026_p4 = scmp.lt.s32.totalorder %s19_s16, %s19_s16 }
   0xa   :  { %p1022_p3 = scmp.ne.s32.totalorder %s19_s16, %s1021_s24  ;;  %p1027_p5 = scmp.lt.s32.totalorder %s1021_s24, %s1021_s24 }
   0xc   :  { %p1028_p6 = por %p1027_p5, %p1026_p4 }
   0xe   :  { %p1029_p7 = pnand %p1028_p6, %p1022_p3 }
  0x10   :  { %1032 = shalt.err (!%p1029_p7)
}
  0x11   :  { %s1084_s25 = smov 1024   ;;  %s1085_s26 = smov 64  }
  0x12   :  { %24 = dma.hbm_to_vmem [thread:$0]  %s1158_s0, 2048, %s19_s16, [#allocation4], %s1084_s25, %s1084_s25, %s1085_s26  }
  0x13   :  { %s1086_s29 = smov [#allocation6]   ;;  %s1033_s7 = scalar_lea.hbm %s1159_s1, 8192 }
  0x14   :  { %s30_s30 = sshll.u32 %s1086_s29, 4  ;;  %p1034_p8 = scmp.ne.s32.totalorder %s1159_s1, %s1033_s7  ;;  %s31_s30 = int_to_ptr.vmem [resolvable:$true] %s30_s30 }
  0x15   :  { %p1037_p9 = scmp.lt.u32.totalorder %s1033_s7, %s1159_s1 }
  0x17   :  { %p1039_p10 = pnand %p1037_p9, %p1034_p8 }
  0x19   :  { %1042 = shalt.err (!%p1039_p10)
}
  0x1a   :  { %s1043_s12 = scalar_lea.vmem %s31_s30, 8192  ;;  %p1048_p12 = scmp.lt.s32.totalorder %s31_s30, %s31_s30 }
  0x1b   :  { %p1044_p11 = scmp.ne.s32.totalorder %s31_s30, %s1043_s12  ;;  %p1049_p13 = scmp.lt.s32.totalorder %s1043_s12, %s1043_s12 }
  0x1d   :  { %p1050_p0 = por %p1049_p13, %p1048_p12 }
  0x1f   :  { %p1051_p1 = pnand %p1050_p0, %p1044_p11 }
  0x21   :  { %1054 = shalt.err (!%p1051_p1)
}
  0x22   :  { %s1087_s0 = smov 4  }
  0x23   :  { %36 = dma.hbm_to_vmem [thread:$0]  %s1159_s1, 8192, %s31_s30, [#allocation7], %s1085_s26, %s1085_s26, %s1087_s0  }
  0x24   :  { %1077 = dma.done.wait [#allocation4], 2048  }
  0x25   :  { %1078 = vsyncadd [#allocation4], 4294965248 }
  0x26   :  { %1079 = dma.done.wait [#allocation7], 8192  }
  0x27   :  { %1080 = vsyncadd [#allocation7], 4294959104  ;;  %v49_v0 = vstv %s1161_s3  ;;  %v945_v1 = vld [vmem:[#allocation6 + $0x40] sm:$0xff]   ;;  %v949_v6 = vld [vmem:[#allocation6 + $0x48] sm:$0xff]   ;;  %s1088_s17 = smov [#allocation8]  }
  0x28   :  { %1009 = vrcp.f32 %v49_v0  ;;  %v946_v2 = vld [vmem:[#allocation6 + $0xc0] sm:$0xff]   ;;  %847 = vmatprep.subr.bf16.mxu0 %v945_v1  ;;  %v950_v7 = vld [vmem:[#allocation6 + $0xc8] sm:$0xff]   ;;  %v953_v10 = vld [vmem:[#allocation6 + $0x50] sm:$0xff]   ;;  %s769_s18 = sshll.u32 %s1088_s17, 4  ;;  %s770_s18 = int_to_ptr.vmem [resolvable:$true] %s769_s18 }
  0x29   :  { %v947_v3 = vld [vmem:[#allocation6] sm:$0xff]   ;;  %869 = vmatprep.subr.bf16.mxu1 %v946_v2  ;;  %v951_v8 = vld [vmem:[#allocation6 + $0x8] sm:$0xff]   ;;  %v954_v11 = vld [vmem:[#allocation6 + $0xd0] sm:$0xff]   ;;  %s1055_s19 = scalar_lea.vmem %s770_s18, 256  ;;  %p1060_p3 = scmp.lt.s32.totalorder %s770_s18, %s770_s18 }
  0x2a   :  { %v948_v4 = vld [vmem:[#allocation6 + $0x80] sm:$0xff]   ;;  %848 = vmatpush3.bf16.msra.mxu0 %v947_v3  ;;  %v952_v9 = vld [vmem:[#allocation6 + $0x88] sm:$0xff]   ;;  %v955_v12 = vld [vmem:[#allocation6 + $0x10] sm:$0xff]   ;;  %p1056_p2 = scmp.ne.s32.totalorder %s770_s18, %s1055_s19  ;;  %p1061_p4 = scmp.lt.s32.totalorder %s1055_s19, %s1055_s19 }
  0x2b   :  { %870 = vmatpush3.bf16.msra.mxu1 %v948_v4  ;;  %849 = vmatprep.subr.bf16.mxu0 %v949_v6  ;;  %v956_v13 = vld [vmem:[#allocation6 + $0x90] sm:$0xff]   ;;  %v957_v14 = vld [vmem:[#allocation6 + $0x58] sm:$0xff]   ;;  %v961_v18 = vld [vmem:[#allocation6 + $0x60] sm:$0xff]  }
  0x2c   :  { %871 = vmatprep.subr.bf16.mxu1 %v950_v7  ;;  %v958_v15 = vld [vmem:[#allocation6 + $0xd8] sm:$0xff]   ;;  %v962_v19 = vld [vmem:[#allocation6 + $0xe0] sm:$0xff]   ;;  %v965_v22 = vld [vmem:[#allocation6 + $0x68] sm:$0xff]   ;;  %p1062_p5 = por %p1061_p4, %p1060_p3 }
  0x2d   :  { %v959_v16 = vld [vmem:[#allocation6 + $0x18] sm:$0xff]   ;;  %v963_v20 = vld [vmem:[#allocation6 + $0x20] sm:$0xff]   ;;  %v966_v23 = vld [vmem:[#allocation6 + $0xe8] sm:$0xff]  }
  0x2e   :  { %850 = vmatpush3.bf16.msra.mxu0 %v951_v8  ;;  %v960_v17 = vld [vmem:[#allocation6 + $0x98] sm:$0xff]   ;;  %v964_v21 = vld [vmem:[#allocation6 + $0xa0] sm:$0xff]   ;;  %v967_v24 = vld [vmem:[#allocation6 + $0x28] sm:$0xff]   ;;  %p1063_p6 = pnand %p1062_p5, %p1056_p2 }
  0x2f   :  { %872 = vmatpush3.bf16.msra.mxu1 %v952_v9  ;;  %851 = vmatprep.subr.bf16.mxu0 %v953_v10  ;;  %v968_v25 = vld [vmem:[#allocation6 + $0xa8] sm:$0xff]   ;;  %v969_v26 = vld [vmem:[#allocation6 + $0x70] sm:$0xff]   ;;  %v973_v30 = vld [vmem:[#allocation6 + $0x78] sm:$0xff]  }
  0x30   :  { %873 = vmatprep.subr.bf16.mxu1 %v954_v11  ;;  %v970_v27 = vld [vmem:[#allocation6 + $0xf0] sm:$0xff]   ;;  %v974_v31 = vld [vmem:[#allocation6 + $0xf8] sm:$0xff]   ;;  %v53_v34 = vld [vmem:[#allocation3 + $0x8] sm:$0xff] }
  0x31   :  { %v971_v28 = vld [vmem:[#allocation6 + $0x30] sm:$0xff]   ;;  %v975_v32 = vld [vmem:[#allocation6 + $0x38] sm:$0xff]   ;;  %v61_v35 = vld [vmem:[#allocation3 + $0x48] sm:$0xff] }
  0x32   :  { %v1010_v5 = vpop.eup %1009  ;;  %852 = vmatpush3.bf16.msra.mxu0 %v955_v12  ;;  %v972_v29 = vld [vmem:[#allocation6 + $0xb0] sm:$0xff]   ;;  %v976_v33 = vld [vmem:[#allocation6 + $0xb8] sm:$0xff]   ;;  %v69_v37 = vpack.c.bf16 %v61_v35, %v53_v34  ;;  %v52_v39 = vld [vmem:[#allocation3] sm:$0xff] }
  0x33   :  { %935 = vpush %v1010_v5  ;;  %874 = vmatpush3.bf16.msra.mxu1 %v956_v13  ;;  %853 = vmatprep.subr.bf16.mxu0 %v957_v14  ;;  %v55_v36 = vld [vmem:[#allocation3 + $0x18] sm:$0xff]  ;;  %v60_v40 = vld [vmem:[#allocation3 + $0x40] sm:$0xff]  ;;  %v54_v43 = vld [vmem:[#allocation3 + $0x10] sm:$0xff] }
  0x34   :  { %875 = vmatprep.subr.bf16.mxu1 %v958_v15  ;;  %v63_v38 = vld [vmem:[#allocation3 + $0x58] sm:$0xff]  ;;  %v68_v42 = vpack.c.bf16 %v60_v40, %v52_v39  ;;  %v62_v44 = vld [vmem:[#allocation3 + $0x50] sm:$0xff]  ;;  %627 = vmatprep.mubr.bf16.mxu0 %v69_v37  ;;  %v977_v46 = vld [vmem:[#allocation6 + $0x140] sm:$0xff]  }
  0x35   :  { %v71_v41 = vpack.c.bf16 %v63_v38, %v55_v36  ;;  %v70_v45 = vpack.c.bf16 %v62_v44, %v54_v43  ;;  %v978_v47 = vld [vmem:[#allocation6 + $0x1c0] sm:$0xff]   ;;  %v981_v50 = vld [vmem:[#allocation6 + $0x148] sm:$0xff]   ;;  %v985_v54 = vld [vmem:[#allocation6 + $0x150] sm:$0xff]  }
  0x36   :  { %854 = vmatpush3.bf16.msra.mxu0 %v959_v16  ;;  %v979_v48 = vld [vmem:[#allocation6 + $0x100] sm:$0xff]   ;;  %v982_v51 = vld [vmem:[#allocation6 + $0x1c8] sm:$0xff]   ;;  %v986_v55 = vld [vmem:[#allocation6 + $0x1d0] sm:$0xff]  }
  0x37   :  { %876 = vmatpush3.bf16.msra.mxu1 %v960_v17  ;;  %855 = vmatprep.subr.bf16.mxu0 %v961_v18  ;;  %v980_v49 = vld [vmem:[#allocation6 + $0x180] sm:$0xff]   ;;  %v983_v52 = vld [vmem:[#allocation6 + $0x108] sm:$0xff]   ;;  %v987_v56 = vld [vmem:[#allocation6 + $0x110] sm:$0xff]  }
  0x38   :  { %877 = vmatprep.subr.bf16.mxu1 %v962_v19  ;;  %668 = vmatprep.mubr.bf16.mxu1 %v71_v41  ;;  %v984_v53 = vld [vmem:[#allocation6 + $0x188] sm:$0xff]   ;;  %v988_v57 = vld [vmem:[#allocation6 + $0x190] sm:$0xff]   ;;  %v989_v58 = vld [vmem:[#allocation6 + $0x158] sm:$0xff]  }
  0x39   :  { %v990_v59 = vld [vmem:[#allocation6 + $0x1d8] sm:$0xff]   ;;  %v993_v62 = vld [vmem:[#allocation6 + $0x160] sm:$0xff]   ;;  %v997_v2 = vld [vmem:[#allocation6 + $0x168] sm:$0xff]  }
  0x3a   :  { %856 = vmatpush3.bf16.msra.mxu0 %v963_v20  ;;  %v991_v60 = vld [vmem:[#allocation6 + $0x118] sm:$0xff]   ;;  %v994_v63 = vld [vmem:[#allocation6 + $0x1e0] sm:$0xff]   ;;  %v998_v3 = vld [vmem:[#allocation6 + $0x1e8] sm:$0xff]  }
  0x3b   :  { %878 = vmatpush3.bf16.msra.mxu1 %v964_v21  ;;  %857 = vmatprep.subr.bf16.mxu0 %v965_v22  ;;  %v992_v61 = vld [vmem:[#allocation6 + $0x198] sm:$0xff]   ;;  %v995_v0 = vld [vmem:[#allocation6 + $0x120] sm:$0xff]   ;;  %v999_v4 = vld [vmem:[#allocation6 + $0x128] sm:$0xff]  }
  0x3c   :  { %879 = vmatprep.subr.bf16.mxu1 %v966_v23  ;;  %v996_v1 = vld [vmem:[#allocation6 + $0x1a0] sm:$0xff]   ;;  %v1000_v5 = vld [vmem:[#allocation6 + $0x1a8] sm:$0xff]   ;;  %v1001_v6 = vld [vmem:[#allocation6 + $0x170] sm:$0xff]  }
  0x3d   :  { %v1002_v7 = vld [vmem:[#allocation6 + $0x1f0] sm:$0xff]   ;;  %v1005_v10 = vld [vmem:[#allocation6 + $0x178] sm:$0xff]   ;;  %v57_v14 = vld [vmem:[#allocation3 + $0x28] sm:$0xff] }
  0x3e   :  { %858 = vmatpush3.bf16.msra.mxu0 %v967_v24  ;;  %v1003_v8 = vld [vmem:[#allocation6 + $0x130] sm:$0xff]   ;;  %v1006_v11 = vld [vmem:[#allocation6 + $0x1f8] sm:$0xff]   ;;  %v65_v15 = vld [vmem:[#allocation3 + $0x68] sm:$0xff] }
  0x3f   :  { %880 = vmatpush3.bf16.msra.mxu1 %v968_v25  ;;  %859 = vmatprep.subr.bf16.mxu0 %v969_v26  ;;  %v1004_v9 = vld [vmem:[#allocation6 + $0x1b0] sm:$0xff]   ;;  %v1007_v12 = vld [vmem:[#allocation6 + $0x138] sm:$0xff]   ;;  %v73_v18 = vpack.c.bf16 %v65_v15, %v57_v14  ;;  %v56_v20 = vld [vmem:[#allocation3 + $0x20] sm:$0xff] }
  0x40   :  { %881 = vmatprep.subr.bf16.mxu1 %v970_v27  ;;  %v1008_v13 = vld [vmem:[#allocation6 + $0x1b8] sm:$0xff]   ;;  %v64_v21 = vld [vmem:[#allocation3 + $0x60] sm:$0xff]  ;;  %v58_v22 = vld [vmem:[#allocation3 + $0x30] sm:$0xff] }
  0x41   :  { %v59_v16 = vld [vmem:[#allocation3 + $0x38] sm:$0xff]  ;;  %v72_v23 = vpack.c.bf16 %v64_v21, %v56_v20  ;;  %v66_v24 = vld [vmem:[#allocation3 + $0x70] sm:$0xff] }
  0x42   :  { %860 = vmatpush3.bf16.msra.mxu0 %v971_v28  ;;  %v67_v17 = vld [vmem:[#allocation3 + $0x78] sm:$0xff]  ;;  %v74_v25 = vpack.c.bf16 %v66_v24, %v58_v22  ;;  %v782_v28 = vld [vmem:[%s1160_s2] ss:$0 sm:$0xff] }
  0x43   :  { %882 = vmatpush3.bf16.msra.mxu1 %v972_v29  ;;  %861 = vmatprep.subr.bf16.mxu0 %v973_v30  ;;  %v75_v19 = vpack.c.bf16 %v67_v17, %v59_v16 }
  0x44   :  { %883 = vmatprep.subr.bf16.mxu1 %v974_v31 }
  0x46   :  { %862 = vmatpush3.bf16.msra.mxu0 %v975_v32 }
  0x47   :  { %884 = vmatpush3.bf16.msra.mxu1 %v976_v33  ;;  %891 = vmatprep.subr.bf16.mxu0 %v977_v46 }
  0x48   :  { %913 = vmatprep.subr.bf16.mxu1 %v978_v47 }
  0x49   :  { %628 = vmatmul.mubr.bf16.vlgmr.msra.gmra.mrb[0].mxu0 %v68_v42 }
  0x4a   :  { %669 = vmatmul.mubr.bf16.vlgmr.msra.gmra.mrb[0].mxu1 %v70_v45  ;;  %892 = vmatpush3.bf16.msra.mxu0 %v979_v48 }
  0x4b   :  { %914 = vmatpush3.bf16.msra.mxu1 %v980_v49  ;;  %893 = vmatprep.subr.bf16.mxu0 %v981_v50 }
  0x4c   :  { %915 = vmatprep.subr.bf16.mxu1 %v982_v51  ;;  %709 = vmatprep.mubr.bf16.mxu0 %v73_v18 }
  0x4d   :  { %750 = vmatprep.mubr.bf16.mxu1 %v75_v19 }
  0x4e   :  { %894 = vmatpush3.bf16.msra.mxu0 %v983_v52 }
  0x4f   :  { %916 = vmatpush3.bf16.msra.mxu1 %v984_v53  ;;  %895 = vmatprep.subr.bf16.mxu0 %v985_v54 }
  0x50   :  { %917 = vmatprep.subr.bf16.mxu1 %v986_v55 }
  0x52   :  { %896 = vmatpush3.bf16.msra.mxu0 %v987_v56 }
  0x53   :  { %918 = vmatpush3.bf16.msra.mxu1 %v988_v57  ;;  %897 = vmatprep.subr.bf16.mxu0 %v989_v58 }
  0x54   :  { %919 = vmatprep.subr.bf16.mxu1 %v990_v59 }
  0x56   :  { %898 = vmatpush3.bf16.msra.mxu0 %v991_v60 }
  0x57   :  { %920 = vmatpush3.bf16.msra.mxu1 %v992_v61  ;;  %899 = vmatprep.subr.bf16.mxu0 %v993_v62 }
  0x58   :  { %921 = vmatprep.subr.bf16.mxu1 %v994_v63 }
  0x5a   :  { %900 = vmatpush3.bf16.msra.mxu0 %v995_v0 }
  0x5b   :  { %922 = vmatpush3.bf16.msra.mxu1 %v996_v1  ;;  %901 = vmatprep.subr.bf16.mxu0 %v997_v2 }
  0x5c   :  { %923 = vmatprep.subr.bf16.mxu1 %v998_v3 }
  0x5e   :  { %902 = vmatpush3.bf16.msra.mxu0 %v999_v4 }
  0x5f   :  { %924 = vmatpush3.bf16.msra.mxu1 %v1000_v5  ;;  %903 = vmatprep.subr.bf16.mxu0 %v1001_v6 }
  0x60   :  { %925 = vmatprep.subr.bf16.mxu1 %v1002_v7 }
  0x62   :  { %904 = vmatpush3.bf16.msra.mxu0 %v1003_v8 }
  0x63   :  { %926 = vmatpush3.bf16.msra.mxu1 %v1004_v9  ;;  %905 = vmatprep.subr.bf16.mxu0 %v1005_v10 }
  0x64   :  { %927 = vmatprep.subr.bf16.mxu1 %v1006_v11  ;;  %s936_s2 = spop %935 }
  0x65   :  { %v759_v56 = vstv %s936_s2 }
  0x66   :  { %906 = vmatpush3.bf16.msra.mxu0 %v1007_v12 }
  0x67   :  { %928 = vmatpush3.bf16.msra.mxu1 %v1008_v13 }
  0x69   :  { %710 = vmatmul.mubr.bf16.vlgmr.msra.gmra.mrb[4].mxu0 %v72_v23 }
  0x6a   :  { %751 = vmatmul.mubr.bf16.vlgmr.msra.gmra.mrb[4].mxu1 %v74_v25 }
 0x11c   :  { %v863_v26 = vpop.f32.mrb[0].mxu0 }
 0x11d   :  { %v885_v27 = vpop.f32.mrb[0].mxu1  ;;  %v864_v29 = vpop.f32.mrb[1].mxu0 }
 0x11e   :  { %v865_v30 = vadd.f32 %v864_v29, %v863_v26  ;;  %v886_v31 = vpop.f32.mrb[1].mxu1  ;;  %v866_v32 = vpop.f32.mrb[2].mxu0 }
 0x11f   :  { %v887_v33 = vadd.f32 %v886_v31, %v885_v27  ;;  %v888_v34 = vpop.f32.mrb[2].mxu1  ;;  %v867_v35 = vpop.f32.mrb[3].mxu0 }
 0x120   :  { %v630_v36 = vadd.f32 %v865_v30, %v782_v28  ;;  %v868_v37 = vadd.f32 %v867_v35, %v866_v32  ;;  %v889_v38 = vpop.f32.mrb[3].mxu1 }
 0x121   :  { %v890_v39 = vadd.f32 %v889_v38, %v888_v34 }
 0x122   :  { %v671_v40 = vadd.f32 %v887_v33, %v630_v36  ;;  %v633_v41 = vadd.f32 %v868_v37, %v782_v28 }
 0x124   :  { %v674_v42 = vadd.f32 %v890_v39, %v633_v41 }
 0x13c   :  { %v907_v43 = vpop.f32.mrb[4].mxu0 }
 0x13d   :  { %v929_v44 = vpop.f32.mrb[4].mxu1  ;;  %v908_v45 = vpop.f32.mrb[5].mxu0 }
 0x13e   :  { %v909_v46 = vadd.f32 %v908_v45, %v907_v43  ;;  %v930_v47 = vpop.f32.mrb[5].mxu1  ;;  %v910_v48 = vpop.f32.mrb[6].mxu0 }
 0x13f   :  { %v931_v49 = vadd.f32 %v930_v47, %v929_v44  ;;  %v932_v50 = vpop.f32.mrb[6].mxu1  ;;  %v911_v51 = vpop.f32.mrb[7].mxu0 }
 0x140   :  { %v712_v52 = vadd.f32 %v909_v46, %v671_v40  ;;  %v912_v53 = vadd.f32 %v911_v51, %v910_v48  ;;  %v933_v54 = vpop.f32.mrb[7].mxu1 }
 0x141   :  { %v934_v55 = vadd.f32 %v933_v54, %v932_v50 }
 0x142   :  { %v753_v57 = vadd.f32 %v931_v49, %v712_v52  ;;  %v715_v58 = vadd.f32 %v912_v53, %v674_v42 }
 0x144   :  { %v756_v59 = vadd.f32 %v934_v55, %v715_v58  ;;  %v760_v60 = vmul.f32 %v759_v56, %v753_v57 }
 0x146   :  { %v761_v61 = vmul.f32 %v759_v56, %v756_v59  ;;  %762 = vst [vmem:[#allocation8] sm:$0xff] %v760_v60 }
 0x148   :  { %763 = vst [vmem:[#allocation8 + $0x8] sm:$0xff] %v761_v61 }
 0x149   :  { %1066 = shalt.err (!%p1063_p6)
}
 0x14a   :  { %s1067_s22 = scalar_lea.hbm %s1162_s4, 256 }
 0x14b   :  { %p1068_p7 = scmp.ne.s32.totalorder %s1162_s4, %s1067_s22  ;;  %p1071_p8 = scmp.lt.u32.totalorder %s1067_s22, %s1162_s4 }
 0x14d   :  { %p1073_p9 = pnand %p1071_p8, %p1068_p7 }
 0x14f   :  { %1076 = shalt.err (!%p1073_p9)
}
 0x150   :  { %s1089_s27 = smov 128   ;;  %s1090_s28 = smov 8  }
 0x151   :  { %775 = dma.vmem_to_hbm [thread:$0]  %s770_s18, 256, %s1162_s4, [#allocation5], %s1089_s27, %s1089_s27, %s1090_s28  }
 0x152   :  { %1081 = dma.done.wait [#allocation5], 256  }
 0x153   :  { %1082 = vsyncadd [#allocation5], 4294967040 }
 0x154   :  { %779 = vsyncpa [#allocation4], 1 }
 0x155   :  { %780 = vsyncpa [#allocation7], 1 }
 0x156   :  { %781 = vsyncpa [#allocation5], 1 }

</bundles_post_ra>
